<compile_context>
chip_gen: v7x
topology: tpu7x:2x2x1
jax: 0.10.0
libtpu: 0.0.40
codegen_flags: <defaults>
</compile_context>

<pallas_src>
import functools

import jax
import jax.numpy as jnp
from jax.experimental import pallas as pl
from jax.experimental.pallas import tpu as pltpu


def _warp_kernel(img_ref, coord_ref, out_ref, *, C, H, W, TQ):
    """Per (batch, q-tile) bilinear warp.

    img_ref  : (1, C*H, W) f32  source image (img_1), full spatial extent
    coord_ref: (1, 2, TQ)  f32  sample coords tile; row 0 = x, row 1 = y
                                (already base_coord + flow, folded host-side)
    out_ref  : (1, C, TQ)  f32  warped_image_2_from_1 tile
    """
    img = img_ref[0]                       # (C*H, W)
    ix = coord_ref[0, 0:1, :]              # (1, TQ)
    iy = coord_ref[0, 1:2, :]              # (1, TQ)

    x0f = jnp.floor(ix)
    y0f = jnp.floor(iy)
    x0 = x0f.astype(jnp.int32)
    y0 = y0f.astype(jnp.int32)
    wx1 = ix - x0f
    wx0 = 1.0 - wx1
    wy1 = iy - y0f
    wy0 = 1.0 - wy1

    # Separable bilinear selection matrices (small: (W, TQ) and (H, TQ)).
    # A corner whose x (resp. y) coordinate falls outside [0, W-1]
    # (resp. [0, H-1]) matches no row and contributes exactly 0 — this is
    # grid_sample's padding_mode='zeros' with no explicit masks.
    kx = jax.lax.broadcasted_iota(jnp.int32, (W, TQ), 0)
    ky = jax.lax.broadcasted_iota(jnp.int32, (H, TQ), 0)
    xmat = ((kx == x0).astype(jnp.float32) * wx0
            + (kx == x0 + 1).astype(jnp.float32) * wx1)        # (W, TQ)
    ymat = ((ky == y0).astype(jnp.float32) * wy0
            + (ky == y0 + 1).astype(jnp.float32) * wy1)        # (H, TQ)

    # Stage 1 (MXU): contract the x (W) axis for every (c, h) row.
    #   tmp[c*H + h, q] = sum_w img[c, h, w] * xmat[w, q]
    tmp = jnp.dot(img, xmat, preferred_element_type=jnp.float32)  # (C*H, TQ)

    # Stage 2 (VPU + XLU): contract the y (H) axis.
    #   out[c, q] = sum_h tmp[c, h, q] * ymat[h, q]
    # The (C*H, TQ) -> (C, H, TQ) reshape is layout-trivial when H % 8 == 0
    # (lane dim TQ untouched, sublane split on an 8-aligned boundary);
    # for other H it is still correct but may relayout.
    tmp3 = tmp.reshape(C, H, TQ)
    out_ref[0] = jnp.sum(tmp3 * ymat[None, :, :], axis=1)


def _vmem_capacity_bytes():
    try:
        return int(pltpu.get_tpu_info().vmem_capacity_bytes)
    except Exception:
        return 64 << 20            # conservative (v7x per-TC physical VMEM)


def _per_step_bytes(C, H, W, TQ):
    """Rough per-grid-step VMEM working set of _warp_kernel."""
    per_tq = (W + H)               # xmat + ymat (f32)
    per_tq += (W + H)              # kx + ky iotas (i32)
    per_tq += 2 * C * H            # tmp + broadcast product
    per_tq += 2 * (2 + C)          # double-buffered coord + out blocks
    return 4 * (per_tq * TQ + 2 * C * H * W)   # + (double-buffered) img block


def _choose_tq(C, H, W, HWp, B, vmem_cap):
    """Largest q-tile that is a multiple of 128, divides the padded HW and
    keeps the kernel working set within ~35% of physical VMEM.  Fails loudly
    if even TQ=128 does not fit (no silent oversizing)."""
    budget = int(0.35 * vmem_cap)
    cap = 2048
    if B == 1 and HWp >= 256:
        cap = min(cap, HWp // 2)   # keep >= 2 grid steps for v7x's 2nd core
    best = None
    t = 128
    while t <= min(HWp, cap):
        if HWp % t == 0 and _per_step_bytes(C, H, W, t) <= budget:
            best = t
        t += 128
    if best is None:
        if _per_step_bytes(C, H, W, 128) > budget:
            raise ValueError(
                "warp_image: even a 128-wide q-tile exceeds the VMEM budget "
                f"({_per_step_bytes(C, H, W, 128)} > {budget} bytes). "
                "Image too large for the dense-weight formulation.")
            # TODO(synk): for such sizes switch to a banded-gather kernel
            # (scalar-prefetch a per-tile source-row band from max|flow|).
        best = 128
    return best


def _build_warp(B, C, H, W, HWp, TQ, vmem_limit, single_buffer_img):
    n_q = HWp // TQ
    img_spec_kwargs = {}
    if single_buffer_img:
        # The image block index never changes along the q axis; a single
        # buffer avoids double-buffering 2 x C*H*W*4 bytes (matters on v7x).
        img_spec_kwargs = dict(pipeline_mode=pl.Buffered(1))
    flops = 2 * B * n_q * (C * H) * W * TQ + 3 * B * n_q * C * H * TQ
    bytes_accessed = 4 * (B * C * H * W + B * 2 * HWp + B * C * HWp)
    return pl.pallas_call(
        functools.partial(_warp_kernel, C=C, H=H, W=W, TQ=TQ),
        out_shape=jax.ShapeDtypeStruct((B, C, HWp), jnp.float32),
        grid_spec=pltpu.PrefetchScalarGridSpec(
            num_scalar_prefetch=0,
            grid=(B, n_q),
            in_specs=[
                # full source image per batch element, (C*H, W) layout
                pl.BlockSpec((1, C * H, W), lambda b, q: (b, 0, 0),
                             **img_spec_kwargs),
                # sample-coordinate q-tile
                pl.BlockSpec((1, 2, TQ), lambda b, q: (b, 0, q)),
            ],
            out_specs=pl.BlockSpec((1, C, TQ), lambda b, q: (b, 0, q)),
        ),
        compiler_params=pltpu.CompilerParams(
            dimension_semantics=("parallel", "parallel"),
            vmem_limit_bytes=vmem_limit,
        ),
        cost_estimate=pl.CostEstimate(
            flops=flops, transcendentals=0, bytes_accessed=bytes_accessed),
    )


def warp_image(img_1, flow_2_1):
    """Equivalent of WarpImage.forward / get_flow_inconsistency_tensor:
    F.grid_sample(img_1, base_coord + flow, align_corners=True, zeros pad).
    The normalize -> denormalize round trip of the PyTorch code cancels,
    leaving ix = ww + flow_x, iy = hh + flow_y.

    img_1   : (B, C, H, W) float32
    flow_2_1: (B, 2, H, W) float32
    returns : (B, C, H, W) float32 warped image
    """
    B, C, H, W = img_1.shape
    assert flow_2_1.shape == (B, 2, H, W)
    HW = H * W
    HWp = ((HW + 127) // 128) * 128   # pad so the q axis always tiles by 128

    # Fold the base pixel grid into the flow host-side: removes the in-kernel
    # integer div/mod and any in-kernel coordinate iota.
    hh, ww = jnp.meshgrid(jnp.arange(H, dtype=jnp.float32),
                          jnp.arange(W, dtype=jnp.float32), indexing="ij")
    base = jnp.stack([ww.reshape(-1), hh.reshape(-1)], axis=0)      # (2, HW)
    coords = flow_2_1.reshape(B, 2, HW).astype(jnp.float32) + base[None]
    if HWp != HW:
        # out-of-range pad coords match no interpolation row -> contribute 0
        coords = jnp.pad(coords, ((0, 0), (0, 0), (0, HWp - HW)),
                         constant_values=-2.0)

    # Sublane-friendly (C*H, W) layout for the MXU LHS.
    img_f = img_1.astype(jnp.float32).reshape(B, C * H, W)

    vmem_cap = _vmem_capacity_bytes()
    TQ = _choose_tq(C, H, W, HWp, B, vmem_cap)
    step_bytes = _per_step_bytes(C, H, W, TQ)
    # Clamp the scoped limit to 75% of physical VMEM (48 MiB on v7x; raises
    # the default 16/32 MiB scoped limit on v5e/v6e) with headroom for Mosaic
    # internal scratch.
    vmem_limit = int(min(int(0.75 * vmem_cap),
                         max(32 << 20, 4 * step_bytes)))

    args = (img_f, coords)
    try:
        out = _build_warp(B, C, H, W, HWp, TQ, vmem_limit,
                          single_buffer_img=True)(*args)
    except Exception:
        # pl.Buffered(1) not accepted on this jax/Mosaic build; fall back to
        # the default double-buffered image block (identical numerics).
        out = _build_warp(B, C, H, W, HWp, TQ, vmem_limit,
                          single_buffer_img=False)(*args)
    return out[:, :, :HW].reshape(B, C, H, W)


def _reference_warp(img, flow):
    """Pure-JAX reference of F.grid_sample(align_corners=True, zeros padding)."""
    B, C, H, W = img.shape
    hh, ww = jnp.meshgrid(jnp.arange(H, dtype=jnp.float32),
                          jnp.arange(W, dtype=jnp.float32), indexing="ij")
    ix = ww[None] + flow[:, 0]
    iy = hh[None] + flow[:, 1]
    x0 = jnp.floor(ix)
    y0 = jnp.floor(iy)
    x1 = x0 + 1
    y1 = y0 + 1
    wx1 = ix - x0
    wx0 = 1.0 - wx1
    wy1 = iy - y0
    wy0 = 1.0 - wy1
    b_idx = jnp.arange(B)[:, None, None, None]
    c_idx = jnp.arange(C)[None, :, None, None]

    def gather(xc, yc, w):
        inb = (xc >= 0) & (xc <= W - 1) & (yc >= 0) & (yc <= H - 1)
        xi = jnp.clip(xc, 0, W - 1).astype(jnp.int32)
        yi = jnp.clip(yc, 0, H - 1).astype(jnp.int32)
        vals = img[b_idx, c_idx, yi[:, None], xi[:, None]]
        return vals * (w * inb)[:, None]

    return (gather(x0, y0, wx0 * wy0) + gather(x1, y0, wx1 * wy0)
            + gather(x0, y1, wx0 * wy1) + gather(x1, y1, wx1 * wy1))


if __name__ == "__main__":
    # NOTE: the reference PyTorch forward() is truncated after expanding
    # base_coord; the intended output is get_flow_inconsistency_tensor(...),
    # i.e. the warped image, which is what we compute here.
    B, C, H, W = 2, 4, 16, 16
    key = jax.random.PRNGKey(0)
    k_img, k_flow = jax.random.split(key)
    img_1 = jax.random.normal(k_img, (B, C, H, W), dtype=jnp.float32)
    flow_2_1 = jax.random.uniform(
        k_flow, (B, 2, H, W), dtype=jnp.float32, minval=-3.0, maxval=3.0)

    out = warp_image(img_1, flow_2_1)
    jax.block_until_ready(out)

    ref = _reference_warp(img_1, flow_2_1)
    assert out.shape == (B, C, H, W)
    assert jnp.allclose(out, ref, atol=1e-4, rtol=1e-4), "mismatch vs reference"
    print("KERNEL_OK")
</pallas_src>

<mosaic_0001>
module attributes {stable_mosaic.version = 11 : i64} {
  func.func @_warp_kernel(%arg0: i32, %arg1: i32, %arg2: memref<1x64x16xf32, #tpu.memory_space<vmem>>, %arg3: memref<1x2x256xf32, #tpu.memory_space<vmem>>, %arg4: memref<1x4x256xf32, #tpu.memory_space<vmem>>) attributes {dimension_semantics = [#tpu.dimension_semantics<parallel>, #tpu.dimension_semantics<parallel>], iteration_bounds = array<i64: 2, 1>, scalar_prefetch = 0 : i64, scratch_operands = 0 : i64, tpu.core_type = #tpu.core_type<tc>, window_params = [{pipeline_mode = #tpu.pipeline_mode<synchronous>, transform_indices = @transform_0, window_bounds = array<i64: 1, 64, 16>}, {transform_indices = @transform_1, window_bounds = array<i64: 1, 2, 256>}, {transform_indices = @transform_2, window_bounds = array<i64: 1, 4, 256>}]} {
    %c0 = arith.constant 0 : index
    %c0_0 = arith.constant 0 : index
    %c0_1 = arith.constant 0 : index
    %0 = vector.load %arg2[%c0, %c0_0, %c0_1] : memref<1x64x16xf32, #tpu.memory_space<vmem>>, vector<1x64x16xf32>
    %1 = vector.shape_cast %0 : vector<1x64x16xf32> to vector<64x16xf32>
    %c0_2 = arith.constant 0 : index
    %c0_3 = arith.constant 0 : index
    %c0_4 = arith.constant 0 : index
    %2 = vector.load %arg3[%c0_2, %c0_3, %c0_4] : memref<1x2x256xf32, #tpu.memory_space<vmem>>, vector<1x1x256xf32>
    %3 = vector.shape_cast %2 : vector<1x1x256xf32> to vector<1x256xf32>
    %c0_5 = arith.constant 0 : index
    %c1 = arith.constant 1 : index
    %c0_6 = arith.constant 0 : index
    %4 = vector.load %arg3[%c0_5, %c1, %c0_6] : memref<1x2x256xf32, #tpu.memory_space<vmem>>, vector<1x1x256xf32>
    %5 = vector.shape_cast %4 : vector<1x1x256xf32> to vector<1x256xf32>
    %6 = math.floor %3 : vector<1x256xf32>
    %7 = math.floor %5 : vector<1x256xf32>
    %8 = arith.fptosi %6 : vector<1x256xf32> to vector<1x256xi32>
    %9 = arith.fptosi %7 : vector<1x256xf32> to vector<1x256xi32>
    %10 = arith.subf %3, %6 : vector<1x256xf32>
    %cst = arith.constant 1.000000e+00 : f32
    %11 = vector.broadcast %cst : f32 to vector<1x256xf32>
    %12 = arith.subf %11, %10 : vector<1x256xf32>
    %13 = arith.subf %5, %7 : vector<1x256xf32>
    %cst_7 = arith.constant 1.000000e+00 : f32
    %14 = vector.broadcast %cst_7 : f32 to vector<1x256xf32>
    %15 = arith.subf %14, %13 : vector<1x256xf32>
    %16 = tpu.iota {dimensions = array<i32: 0>} : vector<16x256xi32>
    %17 = tpu.iota {dimensions = array<i32: 0>} : vector<16x256xi32>
    %18 = vector.broadcast %8 : vector<1x256xi32> to vector<16x256xi32>
    %19 = arith.cmpi eq, %16, %18 : vector<16x256xi32>
    %20 = arith.extui %19 : vector<16x256xi1> to vector<16x256xi32>
    %21 = arith.sitofp %20 : vector<16x256xi32> to vector<16x256xf32>
    %22 = vector.broadcast %12 : vector<1x256xf32> to vector<16x256xf32>
    %23 = arith.mulf %21, %22 : vector<16x256xf32>
    %c1_i32 = arith.constant 1 : i32
    %24 = vector.broadcast %c1_i32 : i32 to vector<1x256xi32>
    %25 = arith.addi %8, %24 : vector<1x256xi32>
    %26 = vector.broadcast %25 : vector<1x256xi32> to vector<16x256xi32>
    %27 = arith.cmpi eq, %16, %26 : vector<16x256xi32>
    %28 = arith.extui %27 : vector<16x256xi1> to vector<16x256xi32>
    %29 = arith.sitofp %28 : vector<16x256xi32> to vector<16x256xf32>
    %30 = vector.broadcast %10 : vector<1x256xf32> to vector<16x256xf32>
    %31 = arith.mulf %29, %30 : vector<16x256xf32>
    %32 = arith.addf %23, %31 : vector<16x256xf32>
    %33 = vector.broadcast %9 : vector<1x256xi32> to vector<16x256xi32>
    %34 = arith.cmpi eq, %17, %33 : vector<16x256xi32>
    %35 = arith.extui %34 : vector<16x256xi1> to vector<16x256xi32>
    %36 = arith.sitofp %35 : vector<16x256xi32> to vector<16x256xf32>
    %37 = vector.broadcast %15 : vector<1x256xf32> to vector<16x256xf32>
    %38 = arith.mulf %36, %37 : vector<16x256xf32>
    %c1_i32_8 = arith.constant 1 : i32
    %39 = vector.broadcast %c1_i32_8 : i32 to vector<1x256xi32>
    %40 = arith.addi %9, %39 : vector<1x256xi32>
    %41 = vector.broadcast %40 : vector<1x256xi32> to vector<16x256xi32>
    %42 = arith.cmpi eq, %17, %41 : vector<16x256xi32>
    %43 = arith.extui %42 : vector<16x256xi1> to vector<16x256xi32>
    %44 = arith.sitofp %43 : vector<16x256xi32> to vector<16x256xf32>
    %45 = vector.broadcast %13 : vector<1x256xf32> to vector<16x256xf32>
    %46 = arith.mulf %44, %45 : vector<16x256xf32>
    %47 = arith.addf %38, %46 : vector<16x256xf32>
    %cst_9 = arith.constant dense<0.000000e+00> : vector<64x256xf32>
    %48 = tpu.matmul %1, %32, %cst_9 {dimension_numbers = #tpu.dot_dimension_numbers<[1], [0], [0], [1], [0, 0, 1, 1], [], []>} : vector<64x16xf32>, vector<16x256xf32>, vector<64x256xf32> -> vector<64x256xf32>
    %49 = vector.shape_cast %48 : vector<64x256xf32> to vector<4x16x256xf32>
    %50 = vector.shape_cast %47 : vector<16x256xf32> to vector<1x16x256xf32>
    %51 = vector.broadcast %50 : vector<1x16x256xf32> to vector<4x16x256xf32>
    %52 = arith.mulf %49, %51 : vector<4x16x256xf32>
    %cst_10 = arith.constant dense<0.000000e+00> : vector<4x256xf32>
    %53 = vector.multi_reduction <add>, %52, %cst_10 [1] : vector<4x16x256xf32> to vector<4x256xf32>
    %c0_11 = arith.constant 0 : index
    %c0_12 = arith.constant 0 : index
    %c0_13 = arith.constant 0 : index
    %54 = vector.load %arg4[%c0_11, %c0_12, %c0_13] : memref<1x4x256xf32, #tpu.memory_space<vmem>>, vector<1x4x256xf32>
    %55 = vector.shape_cast %54 : vector<1x4x256xf32> to vector<4x256xf32>
    %56 = vector.shape_cast %53 : vector<4x256xf32> to vector<1x4x256xf32>
    tpu.vector_store %arg4[%c0_11, %c0_12, %c0_13], %56 {strides = array<i32>} : memref<1x4x256xf32, #tpu.memory_space<vmem>>, vector<1x4x256xf32>,
    return
  }
  func.func @transform_0(%arg0: i32, %arg1: i32) -> (i32, i32, i32) {
    %c0_i32 = arith.constant 0 : i32
    %c0_i32_0 = arith.constant 0 : i32
    %c0_i32_1 = arith.constant 0 : i32
    return %arg0, %c0_i32, %c0_i32_0 : i32, i32, i32
  }
  func.func @transform_1(%arg0: i32, %arg1: i32) -> (i32, i32, i32) {
    %c0_i32 = arith.constant 0 : i32
    %c0_i32_0 = arith.constant 0 : i32
    return %arg0, %c0_i32, %arg1 : i32, i32, i32
  }
  func.func @transform_2(%arg0: i32, %arg1: i32) -> (i32, i32, i32) {
    %c0_i32 = arith.constant 0 : i32
    %c0_i32_0 = arith.constant 0 : i32
    return %arg0, %c0_i32, %arg1 : i32, i32, i32
  }
}

module attributes {stable_mosaic.version = 11 : i64} {
  func.func @_warp_kernel(%arg0: i32, %arg1: i32, %arg2: memref<1x64x16xf32, #tpu.memory_space<vmem>>, %arg3: memref<1x2x256xf32, #tpu.memory_space<vmem>>, %arg4: memref<1x4x256xf32, #tpu.memory_space<vmem>>) attributes {dimension_semantics = [#tpu.dimension_semantics<parallel>, #tpu.dimension_semantics<parallel>], iteration_bounds = array<i64: 2, 1>, scalar_prefetch = 0 : i64, scratch_operands = 0 : i64, tpu.core_type = #tpu.core_type<tc>, window_params = [{transform_indices = @transform_0, window_bounds = array<i64: 1, 64, 16>}, {transform_indices = @transform_1, window_bounds = array<i64: 1, 2, 256>}, {transform_indices = @transform_2, window_bounds = array<i64: 1, 4, 256>}]} {
    %c0 = arith.constant 0 : index
    %c0_0 = arith.constant 0 : index
    %c0_1 = arith.constant 0 : index
    %0 = vector.load %arg2[%c0, %c0_0, %c0_1] : memref<1x64x16xf32, #tpu.memory_space<vmem>>, vector<1x64x16xf32>
    %1 = vector.shape_cast %0 : vector<1x64x16xf32> to vector<64x16xf32>
    %c0_2 = arith.constant 0 : index
    %c0_3 = arith.constant 0 : index
    %c0_4 = arith.constant 0 : index
    %2 = vector.load %arg3[%c0_2, %c0_3, %c0_4] : memref<1x2x256xf32, #tpu.memory_space<vmem>>, vector<1x1x256xf32>
    %3 = vector.shape_cast %2 : vector<1x1x256xf32> to vector<1x256xf32>
    %c0_5 = arith.constant 0 : index
    %c1 = arith.constant 1 : index
    %c0_6 = arith.constant 0 : index
    %4 = vector.load %arg3[%c0_5, %c1, %c0_6] : memref<1x2x256xf32, #tpu.memory_space<vmem>>, vector<1x1x256xf32>
    %5 = vector.shape_cast %4 : vector<1x1x256xf32> to vector<1x256xf32>
    %6 = math.floor %3 : vector<1x256xf32>
    %7 = math.floor %5 : vector<1x256xf32>
    %8 = arith.fptosi %6 : vector<1x256xf32> to vector<1x256xi32>
    %9 = arith.fptosi %7 : vector<1x256xf32> to vector<1x256xi32>
    %10 = arith.subf %3, %6 : vector<1x256xf32>
    %cst = arith.constant 1.000000e+00 : f32
    %11 = vector.broadcast %cst : f32 to vector<1x256xf32>
    %12 = arith.subf %11, %10 : vector<1x256xf32>
    %13 = arith.subf %5, %7 : vector<1x256xf32>
    %cst_7 = arith.constant 1.000000e+00 : f32
    %14 = vector.broadcast %cst_7 : f32 to vector<1x256xf32>
    %15 = arith.subf %14, %13 : vector<1x256xf32>
    %16 = tpu.iota {dimensions = array<i32: 0>} : vector<16x256xi32>
    %17 = tpu.iota {dimensions = array<i32: 0>} : vector<16x256xi32>
    %18 = vector.broadcast %8 : vector<1x256xi32> to vector<16x256xi32>
    %19 = arith.cmpi eq, %16, %18 : vector<16x256xi32>
    %20 = arith.extui %19 : vector<16x256xi1> to vector<16x256xi32>
    %21 = arith.sitofp %20 : vector<16x256xi32> to vector<16x256xf32>
    %22 = vector.broadcast %12 : vector<1x256xf32> to vector<16x256xf32>
    %23 = arith.mulf %21, %22 : vector<16x256xf32>
    %c1_i32 = arith.constant 1 : i32
    %24 = vector.broadcast %c1_i32 : i32 to vector<1x256xi32>
    %25 = arith.addi %8, %24 : vector<1x256xi32>
    %26 = vector.broadcast %25 : vector<1x256xi32> to vector<16x256xi32>
    %27 = arith.cmpi eq, %16, %26 : vector<16x256xi32>
    %28 = arith.extui %27 : vector<16x256xi1> to vector<16x256xi32>
    %29 = arith.sitofp %28 : vector<16x256xi32> to vector<16x256xf32>
    %30 = vector.broadcast %10 : vector<1x256xf32> to vector<16x256xf32>
    %31 = arith.mulf %29, %30 : vector<16x256xf32>
    %32 = arith.addf %23, %31 : vector<16x256xf32>
    %33 = vector.broadcast %9 : vector<1x256xi32> to vector<16x256xi32>
    %34 = arith.cmpi eq, %17, %33 : vector<16x256xi32>
    %35 = arith.extui %34 : vector<16x256xi1> to vector<16x256xi32>
    %36 = arith.sitofp %35 : vector<16x256xi32> to vector<16x256xf32>
    %37 = vector.broadcast %15 : vector<1x256xf32> to vector<16x256xf32>
    %38 = arith.mulf %36, %37 : vector<16x256xf32>
    %c1_i32_8 = arith.constant 1 : i32
    %39 = vector.broadcast %c1_i32_8 : i32 to vector<1x256xi32>
    %40 = arith.addi %9, %39 : vector<1x256xi32>
    %41 = vector.broadcast %40 : vector<1x256xi32> to vector<16x256xi32>
    %42 = arith.cmpi eq, %17, %41 : vector<16x256xi32>
    %43 = arith.extui %42 : vector<16x256xi1> to vector<16x256xi32>
    %44 = arith.sitofp %43 : vector<16x256xi32> to vector<16x256xf32>
    %45 = vector.broadcast %13 : vector<1x256xf32> to vector<16x256xf32>
    %46 = arith.mulf %44, %45 : vector<16x256xf32>
    %47 = arith.addf %38, %46 : vector<16x256xf32>
    %cst_9 = arith.constant dense<0.000000e+00> : vector<64x256xf32>
    %48 = tpu.matmul %1, %32, %cst_9 {dimension_numbers = #tpu.dot_dimension_numbers<[1], [0], [0], [1], [0, 0, 1, 1], [], []>} : vector<64x16xf32>, vector<16x256xf32>, vector<64x256xf32> -> vector<64x256xf32>
    %49 = vector.shape_cast %48 : vector<64x256xf32> to vector<4x16x256xf32>
    %50 = vector.shape_cast %47 : vector<16x256xf32> to vector<1x16x256xf32>
    %51 = vector.broadcast %50 : vector<1x16x256xf32> to vector<4x16x256xf32>
    %52 = arith.mulf %49, %51 : vector<4x16x256xf32>
    %cst_10 = arith.constant dense<0.000000e+00> : vector<4x256xf32>
    %53 = vector.multi_reduction <add>, %52, %cst_10 [1] : vector<4x16x256xf32> to vector<4x256xf32>
    %c0_11 = arith.constant 0 : index
    %c0_12 = arith.constant 0 : index
    %c0_13 = arith.constant 0 : index
    %54 = vector.load %arg4[%c0_11, %c0_12, %c0_13] : memref<1x4x256xf32, #tpu.memory_space<vmem>>, vector<1x4x256xf32>
    %55 = vector.shape_cast %54 : vector<1x4x256xf32> to vector<4x256xf32>
    %56 = vector.shape_cast %53 : vector<4x256xf32> to vector<1x4x256xf32>
    tpu.vector_store %arg4[%c0_11, %c0_12, %c0_13], %56 {strides = array<i32>} : memref<1x4x256xf32, #tpu.memory_space<vmem>>, vector<1x4x256xf32>,
    return
  }
  func.func @transform_0(%arg0: i32, %arg1: i32) -> (i32, i32, i32) {
    %c0_i32 = arith.constant 0 : i32
    %c0_i32_0 = arith.constant 0 : i32
    %c0_i32_1 = arith.constant 0 : i32
    return %arg0, %c0_i32, %c0_i32_0 : i32, i32, i32
  }
  func.func @transform_1(%arg0: i32, %arg1: i32) -> (i32, i32, i32) {
    %c0_i32 = arith.constant 0 : i32
    %c0_i32_0 = arith.constant 0 : i32
    return %arg0, %c0_i32, %arg1 : i32, i32, i32
  }
  func.func @transform_2(%arg0: i32, %arg1: i32) -> (i32, i32, i32) {
    %c0_i32 = arith.constant 0 : i32
    %c0_i32_0 = arith.constant 0 : i32
    return %arg0, %c0_i32, %arg1 : i32, i32, i32
  }
}

</mosaic_0001>

<bundles_post_ra>
// kernel: tpu_custom_call.1
= control target key start
LH: loop header
LB: loop body
LE: loop exit
PB: predicated region body
PF: predicated region fallthrough
CT: control target
= control target key end

     0   :  { %7 = vsyncpa [#allocation3], 0  ;;  %s1138_s0 = inlined_call_operand.vmem [shape: f32[2,64,16], index: 0, kind: input, shape index: {}]   ;;  %s1139_s1 = inlined_call_operand.vmem [shape: f32[2,2,256], index: 1, kind: input, shape index: {}]   ;;  %s1140_s2 = inlined_call_operand.hbm [shape: f32[2,4,256], index: 2, kind: output, shape index: {}]  }
   0x1   :  { %9 = vsyncpa [#allocation3 + $0x1], 0  ;;  %s918_s9 = smov 0   ;;  %s920_s10 = smov 0  }
   0x2   :  { %s922_s11 = smov 0   ;;  %s924_s12 = smov 0  }
   0x3   :  { %s926_s13 = smov 0   ;;  %s928_s14 = smov 0  }
   0x4 LB: > { %s712_s15 = sadd.s32 4294967295, %s899_s14   ;;  %s713_s16 = sadd.s32 4294967294, %s899_s14   ;;  %s899_s14 = sphi %s928_s14, %s15_s14   ;;  %s895_s13 = sphi %s926_s13, %s1147_s13   ;;  %s891_s12 = sphi %s924_s12, %s1146_s12   ;;  %s887_s11 = sphi %s922_s11, %s1145_s11   ;;  %s883_s10 = sphi %s920_s10, %s1144_s10   ;;  %s879_s9 = sphi %s918_s9, %s1143_s9  }
   0x5   : > { %s27_s17 = sadd.s32 1, %s895_s13  ;;  %s90_s18 = sadd.s32 1, %s887_s11 }
   0x6   : > { %p29_p0 = scmp.ge.s32.totalorder %s27_s17, 2  ;;  %p100_p1 = scmp.ne.s32.totalorder %s887_s11, %s883_s10 }
   0x7   : > { %p101_p2 = scmp.eq.s32.totalorder %s712_s15, 1  ;;  %p106_p3 = scmp.ne.s32.totalorder %s883_s10, %s879_s9 }
   0x8   : > { %s1149_s17 = smov (%p29_p0, %s27_s17), 0  ;;  %p107_p5 = scmp.eq.s32.totalorder %s713_s16, 1 }
   0x9   : > { %p958_p4 = por %p101_p2, %p100_p1  ;;  %s85_s20 = ssub.s32 %s895_s13, %s1149_s17 }
   0xa   : > { %p716_p6 = scmp.ge.s32.totalorder %s899_s14, 1  ;;  %p88_p7 = scmp.eq.s32.totalorder %s85_s20, 0 }
   0xb   : > { %p965_p8 = por %p107_p5, %p106_p3  ;;  %p146_p9 = scmp.lt.s32.totalorder %s899_s14, 3 }
   0xc   : > { %s971_s22 = scalar_select %p88_p7, %s887_s11, %s90_s18  }
   0xd   : > { %p147_p10 = pnand %p716_p6, %p146_p9 }
   0xe   : > { %p177_p11 = scmp.lt.s32.totalorder (!%p147_p10), %s891_s12, 1  ;;  %v212_v0 = vlaneseq (!%p147_p10)  ;;  %v901_v1 = vmov (!%p147_p10), 0.0   ;;  %vm365_vm10 = vcmask (!%p147_p10), 130048   ;;  %s174_s4 = sand.u32 (!%p147_p10), 1, %s883_s10  }
   0xf   : > { %150 = sbr.rel (%p147_p10) target bundleno = 316 (0x13c), region = 28  ;;  %454 = vmatprep.mubr.f32.mxu0 (!%p147_p10), %v901_v1  ;;  %478 = vmatprep.mubr.f32.mxu1 (!%p147_p10), %v901_v1  ;;  %s717_s5 = sshll.u32 (!%p147_p10), %s174_s4, 3 }
  0x10   : > { %v980_v2 = vshrl.u32 (!%p147_p10), %v212_v0, 7  ;;  %s754_s6 = sshll.u32 (!%p147_p10), %s891_s12, 7  ;;  %s176_s7 = scalar_lea.vmem (!%p147_p10), [#allocation2], %s717_s5 }
  0x11   : > { %s621_s8 = sshll.u32 (!%p147_p10), %s176_s7, 4  ;;  %s1091_s18 = scalar_lea.hbm (!%p147_p10), %s1140_s2, %s754_s6  ;;  %s1093_s8 = int_to_ptr.vmem [resolvable:$true] %s621_s8 }
  0x12   : > { %v986_v7 = vsub.s32 (!%p147_p10), 1, %v980_v2  ;;  %v217_v8 = vsub.s32 (!%p147_p10), 0, %v980_v2  ;;  %v994_v16 = vadd.s32 (!%p147_p10), 8, %v980_v2  ;;  %s821_s20 = scalar_lea.vmem (!%p147_p10), %s1093_s8, 128 }
  0x13   : > { %p822_p12 = scmp.ne.s32.totalorder (!%p147_p10), %s1093_s8, %s821_s20 }
  0x15   : > { %p823_p13 = pnand (!%p147_p10), %p822_p12, %p958_p4 }
  0x16   : > { %s977_s23 = scalar_select %p177_p11, %s891_s12, 1 }
  0x17   : > { %s605_s12 = scalar_lea.sflag [#allocation3], %s174_s4  ;;  %p824_p0 = pneg %p823_p13 }
  0x18   : > { %s753_s24 = sshll.u32 %s977_s23, 2  ;;  %s752_s28 = sshll.u32 %s977_s23, 6 }
  0x19   : > { %s190_s27 = scalar_lea.vmem %s1139_s1, %s753_s24  ;;  %s181_s3 = scalar_lea.vmem %s1138_s0, %s752_s28 }
  0x1a   : > { %v201_v3 = vld [vmem:[%s190_s27] ss:$2 sm:$0x3]  ;;  %v722_v4 = vld [vmem:[%s190_s27 + $0x1] ss:$2 sm:$0x3] }
  0x1b   : > { %v204_v5 = vfloor.f32 %v201_v3  ;;  %v205_v6 = vfloor.f32 %v722_v4  ;;  %v193_v59 = vld [vmem:[%s181_s3] sm:$0xff]  ;;  %v194_v61 = vld [vmem:[%s181_s3 + $0x8] sm:$0xff]  ;;  %v195_v63 = vld [vmem:[%s181_s3 + $0x10] sm:$0xff]  ;;  %s902_s23 = smov [#allocation2]  }
  0x1c   : > { %v197_v60 = vld [vmem:[%s181_s3 + $0x20] sm:$0xff]  ;;  %v198_v62 = vld [vmem:[%s181_s3 + $0x28] sm:$0xff]  ;;  %v199_v0 = vld [vmem:[%s181_s3 + $0x30] sm:$0xff]  ;;  %s825_s24 = sshll.u32 %s902_s23, 4  ;;  %s826_s24 = int_to_ptr.vmem [resolvable:$false] %s825_s24 }
  0x1d   : > { %v761_v9 = vtrunc.f32 %v204_v5  ;;  %v763_v10 = vtrunc.f32 %v205_v6  ;;  %v208_v11 = vsub.f32 %v201_v3, %v204_v5  ;;  %v989_v12 = vsub.f32 %v722_v4, %v205_v6  ;;  %v196_v3 = vld [vmem:[%s181_s3 + $0x18] sm:$0xff]  ;;  %s827_s25 = scalar_lea.vmem %s826_s24, 256  ;;  %p828_p1 = scmp.lt.s32.totalorder %s1093_s8, %s826_s24 }
  0x1e   : > { %v200_v4 = vld [vmem:[%s181_s3 + $0x38] sm:$0xff]  ;;  %p829_p2 = scmp.lt.s32.totalorder %s827_s25, %s821_s20 }
  0x1f   : > { %v762_v13 = vcvt.f32.s32 %v761_v9  ;;  %v991_v14 = vcvt.f32.s32 %v763_v10  ;;  %v209_v15 = vsub.f32 1.0, %v208_v11  ;;  %v279_v17 = vrot.slane %v208_v11, %v986_v7 }
  0x20   : > { %v211_v18 = vsub.f32 1.0, %v989_v12  ;;  %v999_v19 = vrot.slane %v989_v12, %v217_v8  ;;  %v275_v40 = vrot.slane %v208_v11, %v217_v8  ;;  %p830_p3 = por %p829_p2, %p828_p1 }
  0x21   : > { %v222_v20 = vrot.slane %v762_v13, %v986_v7  ;;  %v243_v21 = vrot.slane %v209_v15, %v986_v7  ;;  %v250_v22 = vadd.s32 1, %v762_v13  ;;  %v218_v23 = vrot.slane %v762_v13, %v217_v8 }
  0x22   : > { %v239_v24 = vrot.slane %v209_v15, %v217_v8  ;;  %v1004_v25 = vrot.slane %v991_v14, %v217_v8  ;;  %v1008_v26 = vrot.slane %v211_v18, %v217_v8  ;;  %v1011_v27 = vadd.s32 1, %v991_v14  ;;  %p831_p5 = pnand %p830_p3, %p824_p0 }
  0x23   : > { %vm224_vm0 = vcmp.eq.s32.totalorder %v980_v2, %v222_v20  ;;  %vm226_vm1 = vcmp.eq.s32.totalorder %v994_v16, %v222_v20  ;;  %v258_v28 = vrot.slane %v250_v22, %v986_v7  ;;  %vm223_vm2 = vcmp.eq.s32.totalorder %v980_v2, %v218_v23 }
  0x24   : > { %v724_v29 = vsel %vm224_vm0, 1.0, %v901_v1  ;;  %v726_v30 = vsel %vm226_vm1, 1.0, %v901_v1  ;;  %vm225_vm3 = vcmp.eq.s32.totalorder %v994_v16, %v218_v23  ;;  %v723_v31 = vsel %vm223_vm2, 1.0, %v901_v1 }
  0x25   : > { %v247_v32 = vmul.f32 %v724_v29, %v243_v21  ;;  %v249_v33 = vmul.f32 %v726_v30, %v243_v21  ;;  %vm260_vm4 = vcmp.eq.s32.totalorder %v980_v2, %v258_v28  ;;  %vm262_vm5 = vcmp.eq.s32.totalorder %v994_v16, %v258_v28 }
  0x26   : > { %v728_v34 = vsel %vm260_vm4, 1.0, %v901_v1  ;;  %v730_v35 = vsel %vm262_vm5, 1.0, %v901_v1  ;;  %v725_v36 = vsel %vm225_vm3, 1.0, %v901_v1  ;;  %v254_v39 = vrot.slane %v250_v22, %v217_v8 }
  0x27   : > { %v283_v37 = vmul.f32 %v728_v34, %v279_v17  ;;  %v285_v38 = vmul.f32 %v730_v35, %v279_v17  ;;  %v246_v41 = vmul.f32 %v723_v31, %v239_v24  ;;  %v248_v42 = vmul.f32 %v725_v36, %v239_v24 }
  0x28   : > { %vm298_vm6 = vcmp.eq.s32.totalorder %v980_v2, %v1004_v25  ;;  %v329_v43 = vrot.slane %v1011_v27, %v217_v8  ;;  %vm259_vm7 = vcmp.eq.s32.totalorder %v980_v2, %v254_v39  ;;  %vm261_vm8 = vcmp.eq.s32.totalorder %v994_v16, %v254_v39 }
  0x29   : > { %v287_v44 = vadd.f32 %v283_v37, %v247_v32  ;;  %v289_v45 = vadd.f32 %v285_v38, %v249_v33  ;;  %v727_v46 = vsel %vm259_vm7, 1.0, %v901_v1  ;;  %v729_v47 = vsel %vm261_vm8, 1.0, %v901_v1 }
  0x2a   : > { %v731_v48 = vsel %vm298_vm6, 1.0, %v901_v1  ;;  %vm334_vm9 = vcmp.eq.s32.totalorder %v980_v2, %v329_v43  ;;  %v282_v50 = vmul.f32 %v727_v46, %v275_v40  ;;  %v284_v51 = vmul.f32 %v729_v47, %v275_v40 }
  0x2b   : > { %v755_v49 = vpack.c.bf16 %v289_v45, %v287_v44  ;;  %v321_v52 = vmul.f32 %v731_v48, %v1008_v26  ;;  %v735_v53 = vsel %vm334_vm9, 1.0, %v901_v1  ;;  %vm300_vm11 = vcmp.eq.s32.totalorder %v994_v16, %v1004_v25 }
  0x2c   : > { %v286_v54 = vadd.f32 %v282_v50, %v246_v41  ;;  %v288_v55 = vadd.f32 %v284_v51, %v248_v42  ;;  %v357_v56 = vmul.f32 %v735_v53, %v999_v19  ;;  %vm336_vm12 = vcmp.eq.s32.totalorder %v994_v16, %v329_v43 }
  0x2d   : > { %756 = vmatprep.subr.bf16.mxu0 %v755_v49  ;;  %759 = vmatprep.subr.bf16.mxu1 %v755_v49  ;;  %v733_v5 = vsel %vm300_vm11, 1.0, %v901_v1  ;;  %v737_v6 = vsel %vm336_vm12, 1.0, %v901_v1  ;;  %v297_v11 = vrot.slane %v991_v14, %v986_v7  ;;  %v333_v13 = vrot.slane %v1011_v27, %v986_v7 }
  0x2e   : > { %v757_v57 = vpack.c.bf16 %v288_v55, %v286_v54  ;;  %v1042_v58 = vadd.f32 %v357_v56, %v321_v52  ;;  %v323_v8 = vmul.f32 %v733_v5, %v1008_v26  ;;  %v359_v9 = vmul.f32 %v737_v6, %v999_v19 }
  0x2f   : > { %vm299_vm13 = vcmp.eq.s32.totalorder %v980_v2, %v297_v11  ;;  %vm335_vm14 = vcmp.eq.s32.totalorder %v980_v2, %v333_v13  ;;  %v318_v15 = vrot.slane %v211_v18, %v986_v7  ;;  %v354_v17 = vrot.slane %v989_v12, %v986_v7 }
  0x30   : > { %758 = vmatpush1.bf16.msra.mxu0 %v757_v57  ;;  %760 = vmatpush1.bf16.msra.mxu1 %v757_v57  ;;  %v363_v10 = vadd.f32 %v359_v9, %v323_v8  ;;  %v732_v19 = vsel %vm299_vm13, 1.0, %v901_v1  ;;  %v736_v20 = vsel %vm335_vm14, 1.0, %v901_v1  ;;  %vm301_vm15 = vcmp.eq.s32.totalorder %v994_v16, %v297_v11 }
  0x31   : > { %vm337_vm0 = vcmp.eq.s32.totalorder %v994_v16, %v333_v13  ;;  %v322_v14 = vmul.f32 %v732_v19, %v318_v15  ;;  %v358_v21 = vmul.f32 %v736_v20, %v354_v17  ;;  %v734_v22 = vsel %vm301_vm15, 1.0, %v901_v1 }
  0x32   : > { %v738_v2 = vsel %vm337_vm0, 1.0, %v901_v1  ;;  %v324_v24 = vmul.f32 %v734_v22, %v318_v15  ;;  %vm588_vm1 = vcmask 1041409   ;;  %vm590_vm2 = vcmask 1045509  }
  0x33   : > { %739 = vmatmul.mubr.msk.f32.vlgmr.msra.gmra.mrb[0].mxu0 %vm365_vm10, %v193_v59  ;;  %743 = vmatmul.mubr.msk.f32.vlgmr.msra.gmra.mrb[0].mxu1 %vm365_vm10, %v197_v60  ;;  %v362_v23 = vadd.f32 %v358_v21, %v322_v14  ;;  %v360_v18 = vmul.f32 %v738_v2, %v354_v17  ;;  %vm593_vm3 = vcmask 1042434   ;;  %vm595_vm4 = vcmask 1046534  }
  0x34   : > { %460 = vmatprep.mubr.f32.mxu0 %v901_v1  ;;  %484 = vmatprep.mubr.f32.mxu1 %v901_v1  ;;  %vm598_vm5 = vcmask 1043459   ;;  %vm600_vm6 = vcmask 1047559  }
  0x35   : > { %v364_v16 = vadd.f32 %v360_v18, %v324_v24 }
  0x37   : > { %740 = vmatmul.mubr.msk.f32.gmra.mrb[2].mxu0 %vm365_vm10, %v194_v61  ;;  %744 = vmatmul.mubr.msk.f32.gmra.mrb[2].mxu1 %vm365_vm10, %v198_v62 }
  0x38   : > { %466 = vmatprep.mubr.f32.mxu0 %v901_v1  ;;  %490 = vmatprep.mubr.f32.mxu1 %v901_v1 }
  0x3b   : > { %741 = vmatmul.mubr.msk.f32.gmra.mrb[4].mxu0 %vm365_vm10, %v195_v63  ;;  %745 = vmatmul.mubr.msk.f32.gmra.mrb[4].mxu1 %vm365_vm10, %v199_v0 }
  0x3c   : > { %472 = vmatprep.mubr.f32.mxu0 %v901_v1  ;;  %496 = vmatprep.mubr.f32.mxu1 %v901_v1 }
  0x3f   : > { %742 = vmatmul.mubr.msk.f32.gmra.mrb[6].mxu0 %vm365_vm10, %v196_v3  ;;  %746 = vmatmul.mubr.msk.f32.gmra.mrb[6].mxu1 %vm365_vm10, %v200_v4 }
 0x106   : > { %v456_v25 = vpop.f32.mrb[0].mxu0  ;;  %v480_v26 = vpop.f32.mrb[0].mxu1 }
 0x107   : > { %v503_v7 = vmul.f32 %v456_v25, %v1042_v58  ;;  %v458_v12 = vpop.f32.mrb[1].mxu0  ;;  %v511_v27 = vmul.f32 %v480_v26, %v1042_v58  ;;  %v482_v28 = vpop.f32.mrb[1].mxu1 }
 0x108   : > { %v504_v29 = vmul.f32 %v458_v12, %v362_v23  ;;  %v512_v30 = vmul.f32 %v482_v28, %v362_v23 }
 0x10a   : > { %v462_v31 = vpop.f32.mrb[2].mxu0  ;;  %v486_v32 = vpop.f32.mrb[2].mxu1 }
 0x10b   : > { %v505_v33 = vmul.f32 %v462_v31, %v363_v10  ;;  %v513_v34 = vmul.f32 %v486_v32, %v363_v10  ;;  %v464_v35 = vpop.f32.mrb[3].mxu0  ;;  %v488_v1 = vpop.f32.mrb[3].mxu1 }
 0x10c   : > { %v506_v36 = vmul.f32 %v464_v35, %v364_v16  ;;  %v514_v37 = vmul.f32 %v488_v1, %v364_v16 }
 0x10d   : > { %v519_v38 = vadd.f32 %v505_v33, %v503_v7  ;;  %v547_v39 = vadd.f32 %v513_v34, %v511_v27 }
 0x10e   : > { %v526_v40 = vadd.f32 %v506_v36, %v504_v29  ;;  %v554_v41 = vadd.f32 %v514_v37, %v512_v30  ;;  %v468_v42 = vpop.f32.mrb[4].mxu0  ;;  %v492_v43 = vpop.f32.mrb[4].mxu1 }
 0x10f   : > { %v520_v44 = vrot.slane %v519_v38, 4  ;;  %v548_v45 = vrot.slane %v547_v39, 4  ;;  %v507_v46 = vmul.f32 %v468_v42, %v1042_v58  ;;  %v470_v47 = vpop.f32.mrb[5].mxu0  ;;  %v515_v48 = vmul.f32 %v492_v43, %v1042_v58  ;;  %v494_v49 = vpop.f32.mrb[5].mxu1 }
 0x110   : > { %v527_v50 = vrot.slane %v526_v40, 4  ;;  %v555_v51 = vrot.slane %v554_v41, 4  ;;  %v508_v52 = vmul.f32 %v470_v47, %v362_v23  ;;  %v516_v53 = vmul.f32 %v494_v49, %v362_v23 }
 0x111   : > { %v521_v54 = vadd.f32 %v520_v44, %v519_v38  ;;  %v549_v55 = vadd.f32 %v548_v45, %v547_v39 }
 0x112   : > { %v528_v56 = vadd.f32 %v527_v50, %v526_v40  ;;  %v556_v57 = vadd.f32 %v555_v51, %v554_v41  ;;  %v474_v59 = vpop.f32.mrb[6].mxu0  ;;  %v498_v60 = vpop.f32.mrb[6].mxu1 }
 0x113   : > { %v522_v61 = vrot.slane %v521_v54, 2  ;;  %v550_v62 = vrot.slane %v549_v55, 2  ;;  %v509_v63 = vmul.f32 %v474_v59, %v363_v10  ;;  %v517_v0 = vmul.f32 %v498_v60, %v363_v10  ;;  %v476_v3 = vpop.f32.mrb[7].mxu0  ;;  %v500_v4 = vpop.f32.mrb[7].mxu1 }
 0x114   : > { %v529_v5 = vrot.slane %v528_v56, 2  ;;  %v557_v6 = vrot.slane %v556_v57, 2  ;;  %v510_v58 = vmul.f32 %v476_v3, %v364_v16  ;;  %v518_v8 = vmul.f32 %v500_v4, %v364_v16 }
 0x115   : > { %v523_v9 = vadd.f32 %v522_v61, %v521_v54  ;;  %v551_v11 = vadd.f32 %v550_v62, %v549_v55  ;;  %v533_v13 = vadd.f32 %v509_v63, %v507_v46  ;;  %v561_v15 = vadd.f32 %v517_v0, %v515_v48 }
 0x116   : > { %v530_v17 = vadd.f32 %v529_v5, %v528_v56  ;;  %v558_v19 = vadd.f32 %v557_v6, %v556_v57  ;;  %v540_v20 = vadd.f32 %v510_v58, %v508_v52  ;;  %v568_v14 = vadd.f32 %v518_v8, %v516_v53 }
 0x117   : > { %v524_v21 = vrot.slane %v523_v9, 1  ;;  %v552_v22 = vrot.slane %v551_v11, 1  ;;  %v534_v2 = vrot.slane %v533_v13, 4  ;;  %v562_v23 = vrot.slane %v561_v15, 4 }
 0x118   : > { %v531_v24 = vrot.slane %v530_v17, 1  ;;  %v559_v10 = vrot.slane %v558_v19, 1  ;;  %v541_v18 = vrot.slane %v540_v20, 4  ;;  %v569_v25 = vrot.slane %v568_v14, 4 }
 0x119   : > { %v525_v26 = vadd.f32 %v524_v21, %v523_v9  ;;  %v553_v7 = vadd.f32 %v552_v22, %v551_v11  ;;  %v535_v12 = vadd.f32 %v534_v2, %v533_v13  ;;  %v563_v27 = vadd.f32 %v562_v23, %v561_v15 }
 0x11a   : > { %v532_v28 = vadd.f32 %v531_v24, %v530_v17  ;;  %v560_v29 = vadd.f32 %v559_v10, %v558_v19  ;;  %v542_v30 = vadd.f32 %v541_v18, %v540_v20  ;;  %v570_v16 = vadd.f32 %v569_v25, %v568_v14 }
 0x11b   : > { %v536_v31 = vrot.slane %v535_v12, 2  ;;  %v564_v32 = vrot.slane %v563_v27, 2 }
 0x11c   : > { %v583_v33 = vcombine.low %v525_v26, %v532_v28  ;;  %v585_v34 = vcombine.low %v553_v7, %v560_v29  ;;  %v543_v35 = vrot.slane %v542_v30, 2  ;;  %v571_v1 = vrot.slane %v570_v16, 2 }
 0x11d   : > { %v537_v36 = vadd.f32 %v536_v31, %v535_v12  ;;  %v565_v37 = vadd.f32 %v564_v32, %v563_v27 }
 0x11e   : > { %v544_v38 = vadd.f32 %v543_v35, %v542_v30  ;;  %v572_v39 = vadd.f32 %v571_v1, %v570_v16  ;;  %v592_v51 = vrot.slane %v585_v34, 6 }
 0x11f   : > { %v538_v40 = vrot.slane %v537_v36, 1  ;;  %v566_v41 = vrot.slane %v565_v37, 1 }
 0x120   : > { %v545_v42 = vrot.slane %v544_v38, 1  ;;  %v573_v43 = vrot.slane %v572_v39, 1 }
 0x121   : > { %v539_v44 = vadd.f32 %v538_v40, %v537_v36  ;;  %v567_v45 = vadd.f32 %v566_v41, %v565_v37 }
 0x122   : > { %v546_v46 = vadd.f32 %v545_v42, %v544_v38  ;;  %v574_v47 = vadd.f32 %v573_v43, %v572_v39 }
 0x124   : > { %v584_v48 = vcombine.low %v539_v44, %v546_v46  ;;  %v586_v49 = vcombine.low %v567_v45, %v574_v47 }
 0x126   : > { %v587_v50 = vrot.slane %v584_v48, 7  ;;  %v597_v55 = vrot.slane %v586_v49, 5 }
 0x128   : > { %v589_v52 = vsel %vm588_vm1, %v587_v50, %v583_v33 }
 0x129   : > { %v591_v53 = vsel %vm590_vm2, %v587_v50, %v589_v52 }
 0x12a   : > { %v594_v54 = vsel %vm593_vm3, %v592_v51, %v591_v53 }
 0x12b   : > { %v596_v56 = vsel %vm595_vm4, %v592_v51, %v594_v54 }
 0x12c   : > { %v599_v57 = vsel %vm598_vm5, %v597_v55, %v596_v56 }
 0x12d   : > { %v601_v59 = vsel %vm600_vm6, %v597_v55, %v599_v57 }
 0x12e   : > { %603 = vst [vmem:[%s176_s7] sm:$0xff] %v601_v59 }
 0x12f   : > { %834 = shalt.err (!%p831_p5)
}
 0x130   : > { %s835_s26 = scalar_lea.hbm %s1091_s18, 128  ;;  %s839_s29 = scalar_lea.hbm %s1140_s2, 256 }
 0x131   : > { %p836_p6 = scmp.ne.s32.totalorder %s1091_s18, %s835_s26  ;;  %p840_p10 = scmp.lt.u32.totalorder %s1091_s18, %s1140_s2 }
 0x132   : > { %p841_p11 = scmp.lt.u32.totalorder %s839_s29, %s835_s26  ;;  %p843_p13 = scmp.lt.u32.totalorder %s835_s26, %s1091_s18 }
 0x133   : > { %p837_p7 = pnand %p836_p6, %p958_p4 }
 0x134   : > { %p842_p12 = por %p841_p11, %p840_p10 }
 0x135   : > { %p838_p9 = pneg %p837_p7 }
 0x136   : > { %p844_p0 = por %p843_p13, %p842_p12 }
 0x138   : > { %p845_p1 = pnand %p844_p0, %p838_p9 }
 0x13a   : > { %848 = shalt.err (!%p845_p1)
}
 0x13b   : > { %765 = dma.vmem_to_hbm [thread:$0]  (%p958_p4), %s1093_s8, 128, %s1091_s18, %s605_s12  }
 0x13c PF: > { %p771_p2 = scmp.ge.s32.totalorder %s899_s14, 2  ;;  %s633_s4 = sand.u32 1, %s879_s9  }
 0x13d   : > { %s634_s5 = scalar_lea.sflag [#allocation3], %s633_s4 }
 0x13e   : > { %p768_p3 = pnand %p771_p2, %p965_p8 }
 0x140   : > { %874 = dma.done.wait (!%p768_p3), %s634_s5, 128  }
 0x141   : > { %876 = vsyncadd (!%p768_p3), %s634_s5, 4294967168  ;;  %s15_s14 = sadd.s32 1, %s899_s14   ;;  %s1143_s9 = smov %s883_s10 }
 0x142   : > { %p12_p5 = scmp.ge.s32.totalorder %s15_s14, 4   ;;  %s1144_s10 = smov %s887_s11 }
 0x143   : > { %s1145_s11 = smov %s971_s22  ;;  %s1146_s12 = smov %s895_s13 }
 0x144   : > { %s1147_s13 = smov %s1149_s17  ;;  %14 = sbr.rel (!%p12_p5) target bundleno = 4 (0x4), region = 67 }
 0x14b   :  { %639 = vsyncpa [#allocation3], 1 }
 0x14c   :  { %641 = vsyncpa [#allocation3 + $0x1], 1 }

// kernel: tpu_custom_call.1
= control target key start
LH: loop header
LB: loop body
LE: loop exit
PB: predicated region body
PF: predicated region fallthrough
CT: control target
= control target key end

     0   :  { %7 = vsyncpa [#allocation3], 0  ;;  %s1135_s0 = inlined_call_operand.vmem [shape: f32[2,64,16], index: 0, kind: input, shape index: {}]   ;;  %s1136_s1 = inlined_call_operand.vmem [shape: f32[2,2,256], index: 1, kind: input, shape index: {}]   ;;  %s1137_s2 = inlined_call_operand.hbm [shape: f32[2,4,256], index: 2, kind: output, shape index: {}]  }
   0x1   :  { %9 = vsyncpa [#allocation3 + $0x1], 0  ;;  %s915_s9 = smov 0   ;;  %s917_s10 = smov 0  }
   0x2   :  { %s919_s11 = smov 0   ;;  %s921_s12 = smov 0  }
   0x3   :  { %s923_s13 = smov 0   ;;  %s925_s14 = smov 0  }
   0x4 LB: > { %s709_s15 = sadd.s32 4294967295, %s896_s14   ;;  %s710_s16 = sadd.s32 4294967294, %s896_s14   ;;  %s896_s14 = sphi %s925_s14, %s15_s14   ;;  %s892_s13 = sphi %s923_s13, %s1144_s13   ;;  %s888_s12 = sphi %s921_s12, %s1143_s12   ;;  %s884_s11 = sphi %s919_s11, %s1142_s11   ;;  %s880_s10 = sphi %s917_s10, %s1141_s10   ;;  %s876_s9 = sphi %s915_s9, %s1140_s9  }
   0x5   : > { %s27_s17 = sadd.s32 1, %s892_s13  ;;  %s90_s18 = sadd.s32 1, %s884_s11 }
   0x6   : > { %p29_p0 = scmp.ge.s32.totalorder %s27_s17, 2  ;;  %p100_p1 = scmp.ne.s32.totalorder %s884_s11, %s880_s10 }
   0x7   : > { %p101_p2 = scmp.eq.s32.totalorder %s709_s15, 1  ;;  %p106_p3 = scmp.ne.s32.totalorder %s880_s10, %s876_s9 }
   0x8   : > { %s1146_s17 = smov (%p29_p0, %s27_s17), 0  ;;  %p107_p5 = scmp.eq.s32.totalorder %s710_s16, 1 }
   0x9   : > { %p955_p4 = por %p101_p2, %p100_p1  ;;  %s85_s20 = ssub.s32 %s892_s13, %s1146_s17 }
   0xa   : > { %p713_p6 = scmp.ge.s32.totalorder %s896_s14, 1  ;;  %p88_p7 = scmp.eq.s32.totalorder %s85_s20, 0 }
   0xb   : > { %p962_p8 = por %p107_p5, %p106_p3  ;;  %p146_p9 = scmp.lt.s32.totalorder %s896_s14, 3 }
   0xc   : > { %s968_s22 = scalar_select %p88_p7, %s884_s11, %s90_s18  }
   0xd   : > { %p147_p10 = pnand %p713_p6, %p146_p9 }
   0xe   : > { %p177_p11 = scmp.lt.s32.totalorder (!%p147_p10), %s888_s12, 1  ;;  %v212_v0 = vlaneseq (!%p147_p10)  ;;  %v898_v1 = vmov (!%p147_p10), 0.0   ;;  %vm365_vm10 = vcmask (!%p147_p10), 130048   ;;  %s174_s4 = sand.u32 (!%p147_p10), 1, %s880_s10  }
   0xf   : > { %150 = sbr.rel (%p147_p10) target bundleno = 316 (0x13c), region = 28  ;;  %454 = vmatprep.mubr.f32.mxu0 (!%p147_p10), %v898_v1  ;;  %478 = vmatprep.mubr.f32.mxu1 (!%p147_p10), %v898_v1  ;;  %s714_s5 = sshll.u32 (!%p147_p10), %s174_s4, 3 }
  0x10   : > { %v977_v2 = vshrl.u32 (!%p147_p10), %v212_v0, 7  ;;  %s751_s6 = sshll.u32 (!%p147_p10), %s888_s12, 7  ;;  %s176_s7 = scalar_lea.vmem (!%p147_p10), [#allocation2], %s714_s5 }
  0x11   : > { %s621_s8 = sshll.u32 (!%p147_p10), %s176_s7, 4  ;;  %s1088_s18 = scalar_lea.hbm (!%p147_p10), %s1137_s2, %s751_s6  ;;  %s1090_s8 = int_to_ptr.vmem [resolvable:$true] %s621_s8 }
  0x12   : > { %v983_v7 = vsub.s32 (!%p147_p10), 1, %v977_v2  ;;  %v217_v8 = vsub.s32 (!%p147_p10), 0, %v977_v2  ;;  %v991_v16 = vadd.s32 (!%p147_p10), 8, %v977_v2  ;;  %s818_s20 = scalar_lea.vmem (!%p147_p10), %s1090_s8, 128 }
  0x13   : > { %p819_p12 = scmp.ne.s32.totalorder (!%p147_p10), %s1090_s8, %s818_s20 }
  0x15   : > { %p820_p13 = pnand (!%p147_p10), %p819_p12, %p955_p4 }
  0x16   : > { %s974_s23 = scalar_select %p177_p11, %s888_s12, 1 }
  0x17   : > { %s605_s12 = scalar_lea.sflag [#allocation3], %s174_s4  ;;  %p821_p0 = pneg %p820_p13 }
  0x18   : > { %s750_s24 = sshll.u32 %s974_s23, 2  ;;  %s749_s28 = sshll.u32 %s974_s23, 6 }
  0x19   : > { %s190_s27 = scalar_lea.vmem %s1136_s1, %s750_s24  ;;  %s181_s3 = scalar_lea.vmem %s1135_s0, %s749_s28 }
  0x1a   : > { %v201_v3 = vld [vmem:[%s190_s27] ss:$2 sm:$0x3]  ;;  %v719_v4 = vld [vmem:[%s190_s27 + $0x1] ss:$2 sm:$0x3] }
  0x1b   : > { %v204_v5 = vfloor.f32 %v201_v3  ;;  %v205_v6 = vfloor.f32 %v719_v4  ;;  %v193_v59 = vld [vmem:[%s181_s3] sm:$0xff]  ;;  %v194_v61 = vld [vmem:[%s181_s3 + $0x8] sm:$0xff]  ;;  %v195_v63 = vld [vmem:[%s181_s3 + $0x10] sm:$0xff]  ;;  %s899_s23 = smov [#allocation2]  }
  0x1c   : > { %v197_v60 = vld [vmem:[%s181_s3 + $0x20] sm:$0xff]  ;;  %v198_v62 = vld [vmem:[%s181_s3 + $0x28] sm:$0xff]  ;;  %v199_v0 = vld [vmem:[%s181_s3 + $0x30] sm:$0xff]  ;;  %s822_s24 = sshll.u32 %s899_s23, 4  ;;  %s823_s24 = int_to_ptr.vmem [resolvable:$false] %s822_s24 }
  0x1d   : > { %v758_v9 = vtrunc.f32 %v204_v5  ;;  %v760_v10 = vtrunc.f32 %v205_v6  ;;  %v208_v11 = vsub.f32 %v201_v3, %v204_v5  ;;  %v986_v12 = vsub.f32 %v719_v4, %v205_v6  ;;  %v196_v3 = vld [vmem:[%s181_s3 + $0x18] sm:$0xff]  ;;  %s824_s25 = scalar_lea.vmem %s823_s24, 256  ;;  %p825_p1 = scmp.lt.s32.totalorder %s1090_s8, %s823_s24 }
  0x1e   : > { %v200_v4 = vld [vmem:[%s181_s3 + $0x38] sm:$0xff]  ;;  %p826_p2 = scmp.lt.s32.totalorder %s824_s25, %s818_s20 }
  0x1f   : > { %v759_v13 = vcvt.f32.s32 %v758_v9  ;;  %v988_v14 = vcvt.f32.s32 %v760_v10  ;;  %v209_v15 = vsub.f32 1.0, %v208_v11  ;;  %v279_v17 = vrot.slane %v208_v11, %v983_v7 }
  0x20   : > { %v211_v18 = vsub.f32 1.0, %v986_v12  ;;  %v996_v19 = vrot.slane %v986_v12, %v217_v8  ;;  %v275_v40 = vrot.slane %v208_v11, %v217_v8  ;;  %p827_p3 = por %p826_p2, %p825_p1 }
  0x21   : > { %v222_v20 = vrot.slane %v759_v13, %v983_v7  ;;  %v243_v21 = vrot.slane %v209_v15, %v983_v7  ;;  %v250_v22 = vadd.s32 1, %v759_v13  ;;  %v218_v23 = vrot.slane %v759_v13, %v217_v8 }
  0x22   : > { %v239_v24 = vrot.slane %v209_v15, %v217_v8  ;;  %v1001_v25 = vrot.slane %v988_v14, %v217_v8  ;;  %v1005_v26 = vrot.slane %v211_v18, %v217_v8  ;;  %v1008_v27 = vadd.s32 1, %v988_v14  ;;  %p828_p5 = pnand %p827_p3, %p821_p0 }
  0x23   : > { %vm224_vm0 = vcmp.eq.s32.totalorder %v977_v2, %v222_v20  ;;  %vm226_vm1 = vcmp.eq.s32.totalorder %v991_v16, %v222_v20  ;;  %v258_v28 = vrot.slane %v250_v22, %v983_v7  ;;  %vm223_vm2 = vcmp.eq.s32.totalorder %v977_v2, %v218_v23 }
  0x24   : > { %v721_v29 = vsel %vm224_vm0, 1.0, %v898_v1  ;;  %v723_v30 = vsel %vm226_vm1, 1.0, %v898_v1  ;;  %vm225_vm3 = vcmp.eq.s32.totalorder %v991_v16, %v218_v23  ;;  %v720_v31 = vsel %vm223_vm2, 1.0, %v898_v1 }
  0x25   : > { %v247_v32 = vmul.f32 %v721_v29, %v243_v21  ;;  %v249_v33 = vmul.f32 %v723_v30, %v243_v21  ;;  %vm260_vm4 = vcmp.eq.s32.totalorder %v977_v2, %v258_v28  ;;  %vm262_vm5 = vcmp.eq.s32.totalorder %v991_v16, %v258_v28 }
  0x26   : > { %v725_v34 = vsel %vm260_vm4, 1.0, %v898_v1  ;;  %v727_v35 = vsel %vm262_vm5, 1.0, %v898_v1  ;;  %v722_v36 = vsel %vm225_vm3, 1.0, %v898_v1  ;;  %v254_v39 = vrot.slane %v250_v22, %v217_v8 }
  0x27   : > { %v283_v37 = vmul.f32 %v725_v34, %v279_v17  ;;  %v285_v38 = vmul.f32 %v727_v35, %v279_v17  ;;  %v246_v41 = vmul.f32 %v720_v31, %v239_v24  ;;  %v248_v42 = vmul.f32 %v722_v36, %v239_v24 }
  0x28   : > { %vm298_vm6 = vcmp.eq.s32.totalorder %v977_v2, %v1001_v25  ;;  %v329_v43 = vrot.slane %v1008_v27, %v217_v8  ;;  %vm259_vm7 = vcmp.eq.s32.totalorder %v977_v2, %v254_v39  ;;  %vm261_vm8 = vcmp.eq.s32.totalorder %v991_v16, %v254_v39 }
  0x29   : > { %v287_v44 = vadd.f32 %v283_v37, %v247_v32  ;;  %v289_v45 = vadd.f32 %v285_v38, %v249_v33  ;;  %v724_v46 = vsel %vm259_vm7, 1.0, %v898_v1  ;;  %v726_v47 = vsel %vm261_vm8, 1.0, %v898_v1 }
  0x2a   : > { %v728_v48 = vsel %vm298_vm6, 1.0, %v898_v1  ;;  %vm334_vm9 = vcmp.eq.s32.totalorder %v977_v2, %v329_v43  ;;  %v282_v50 = vmul.f32 %v724_v46, %v275_v40  ;;  %v284_v51 = vmul.f32 %v726_v47, %v275_v40 }
  0x2b   : > { %v752_v49 = vpack.c.bf16 %v289_v45, %v287_v44  ;;  %v321_v52 = vmul.f32 %v728_v48, %v1005_v26  ;;  %v732_v53 = vsel %vm334_vm9, 1.0, %v898_v1  ;;  %vm300_vm11 = vcmp.eq.s32.totalorder %v991_v16, %v1001_v25 }
  0x2c   : > { %v286_v54 = vadd.f32 %v282_v50, %v246_v41  ;;  %v288_v55 = vadd.f32 %v284_v51, %v248_v42  ;;  %v357_v56 = vmul.f32 %v732_v53, %v996_v19  ;;  %vm336_vm12 = vcmp.eq.s32.totalorder %v991_v16, %v329_v43 }
  0x2d   : > { %753 = vmatprep.subr.bf16.mxu0 %v752_v49  ;;  %756 = vmatprep.subr.bf16.mxu1 %v752_v49  ;;  %v730_v5 = vsel %vm300_vm11, 1.0, %v898_v1  ;;  %v734_v6 = vsel %vm336_vm12, 1.0, %v898_v1  ;;  %v297_v11 = vrot.slane %v988_v14, %v983_v7  ;;  %v333_v13 = vrot.slane %v1008_v27, %v983_v7 }
  0x2e   : > { %v754_v57 = vpack.c.bf16 %v288_v55, %v286_v54  ;;  %v1039_v58 = vadd.f32 %v357_v56, %v321_v52  ;;  %v323_v8 = vmul.f32 %v730_v5, %v1005_v26  ;;  %v359_v9 = vmul.f32 %v734_v6, %v996_v19 }
  0x2f   : > { %vm299_vm13 = vcmp.eq.s32.totalorder %v977_v2, %v297_v11  ;;  %vm335_vm14 = vcmp.eq.s32.totalorder %v977_v2, %v333_v13  ;;  %v318_v15 = vrot.slane %v211_v18, %v983_v7  ;;  %v354_v17 = vrot.slane %v986_v12, %v983_v7 }
  0x30   : > { %755 = vmatpush1.bf16.msra.mxu0 %v754_v57  ;;  %757 = vmatpush1.bf16.msra.mxu1 %v754_v57  ;;  %v363_v10 = vadd.f32 %v359_v9, %v323_v8  ;;  %v729_v19 = vsel %vm299_vm13, 1.0, %v898_v1  ;;  %v733_v20 = vsel %vm335_vm14, 1.0, %v898_v1  ;;  %vm301_vm15 = vcmp.eq.s32.totalorder %v991_v16, %v297_v11 }
  0x31   : > { %vm337_vm0 = vcmp.eq.s32.totalorder %v991_v16, %v333_v13  ;;  %v322_v14 = vmul.f32 %v729_v19, %v318_v15  ;;  %v358_v21 = vmul.f32 %v733_v20, %v354_v17  ;;  %v731_v22 = vsel %vm301_vm15, 1.0, %v898_v1 }
  0x32   : > { %v735_v2 = vsel %vm337_vm0, 1.0, %v898_v1  ;;  %v324_v24 = vmul.f32 %v731_v22, %v318_v15  ;;  %vm588_vm1 = vcmask 1041409   ;;  %vm590_vm2 = vcmask 1045509  }
  0x33   : > { %736 = vmatmul.mubr.msk.f32.vlgmr.msra.gmra.mrb[0].mxu0 %vm365_vm10, %v193_v59  ;;  %740 = vmatmul.mubr.msk.f32.vlgmr.msra.gmra.mrb[0].mxu1 %vm365_vm10, %v197_v60  ;;  %v362_v23 = vadd.f32 %v358_v21, %v322_v14  ;;  %v360_v18 = vmul.f32 %v735_v2, %v354_v17  ;;  %vm593_vm3 = vcmask 1042434   ;;  %vm595_vm4 = vcmask 1046534  }
  0x34   : > { %460 = vmatprep.mubr.f32.mxu0 %v898_v1  ;;  %484 = vmatprep.mubr.f32.mxu1 %v898_v1  ;;  %vm598_vm5 = vcmask 1043459   ;;  %vm600_vm6 = vcmask 1047559  }
  0x35   : > { %v364_v16 = vadd.f32 %v360_v18, %v324_v24 }
  0x37   : > { %737 = vmatmul.mubr.msk.f32.gmra.mrb[2].mxu0 %vm365_vm10, %v194_v61  ;;  %741 = vmatmul.mubr.msk.f32.gmra.mrb[2].mxu1 %vm365_vm10, %v198_v62 }
  0x38   : > { %466 = vmatprep.mubr.f32.mxu0 %v898_v1  ;;  %490 = vmatprep.mubr.f32.mxu1 %v898_v1 }
  0x3b   : > { %738 = vmatmul.mubr.msk.f32.gmra.mrb[4].mxu0 %vm365_vm10, %v195_v63  ;;  %742 = vmatmul.mubr.msk.f32.gmra.mrb[4].mxu1 %vm365_vm10, %v199_v0 }
  0x3c   : > { %472 = vmatprep.mubr.f32.mxu0 %v898_v1  ;;  %496 = vmatprep.mubr.f32.mxu1 %v898_v1 }
  0x3f   : > { %739 = vmatmul.mubr.msk.f32.gmra.mrb[6].mxu0 %vm365_vm10, %v196_v3  ;;  %743 = vmatmul.mubr.msk.f32.gmra.mrb[6].mxu1 %vm365_vm10, %v200_v4 }
 0x106   : > { %v456_v25 = vpop.f32.mrb[0].mxu0  ;;  %v480_v26 = vpop.f32.mrb[0].mxu1 }
 0x107   : > { %v503_v7 = vmul.f32 %v456_v25, %v1039_v58  ;;  %v458_v12 = vpop.f32.mrb[1].mxu0  ;;  %v511_v27 = vmul.f32 %v480_v26, %v1039_v58  ;;  %v482_v28 = vpop.f32.mrb[1].mxu1 }
 0x108   : > { %v504_v29 = vmul.f32 %v458_v12, %v362_v23  ;;  %v512_v30 = vmul.f32 %v482_v28, %v362_v23 }
 0x10a   : > { %v462_v31 = vpop.f32.mrb[2].mxu0  ;;  %v486_v32 = vpop.f32.mrb[2].mxu1 }
 0x10b   : > { %v505_v33 = vmul.f32 %v462_v31, %v363_v10  ;;  %v513_v34 = vmul.f32 %v486_v32, %v363_v10  ;;  %v464_v35 = vpop.f32.mrb[3].mxu0  ;;  %v488_v1 = vpop.f32.mrb[3].mxu1 }
 0x10c   : > { %v506_v36 = vmul.f32 %v464_v35, %v364_v16  ;;  %v514_v37 = vmul.f32 %v488_v1, %v364_v16 }
 0x10d   : > { %v519_v38 = vadd.f32 %v505_v33, %v503_v7  ;;  %v547_v39 = vadd.f32 %v513_v34, %v511_v27 }
 0x10e   : > { %v526_v40 = vadd.f32 %v506_v36, %v504_v29  ;;  %v554_v41 = vadd.f32 %v514_v37, %v512_v30  ;;  %v468_v42 = vpop.f32.mrb[4].mxu0  ;;  %v492_v43 = vpop.f32.mrb[4].mxu1 }
 0x10f   : > { %v520_v44 = vrot.slane %v519_v38, 4  ;;  %v548_v45 = vrot.slane %v547_v39, 4  ;;  %v507_v46 = vmul.f32 %v468_v42, %v1039_v58  ;;  %v470_v47 = vpop.f32.mrb[5].mxu0  ;;  %v515_v48 = vmul.f32 %v492_v43, %v1039_v58  ;;  %v494_v49 = vpop.f32.mrb[5].mxu1 }
 0x110   : > { %v527_v50 = vrot.slane %v526_v40, 4  ;;  %v555_v51 = vrot.slane %v554_v41, 4  ;;  %v508_v52 = vmul.f32 %v470_v47, %v362_v23  ;;  %v516_v53 = vmul.f32 %v494_v49, %v362_v23 }
 0x111   : > { %v521_v54 = vadd.f32 %v520_v44, %v519_v38  ;;  %v549_v55 = vadd.f32 %v548_v45, %v547_v39 }
 0x112   : > { %v528_v56 = vadd.f32 %v527_v50, %v526_v40  ;;  %v556_v57 = vadd.f32 %v555_v51, %v554_v41  ;;  %v474_v59 = vpop.f32.mrb[6].mxu0  ;;  %v498_v60 = vpop.f32.mrb[6].mxu1 }
 0x113   : > { %v522_v61 = vrot.slane %v521_v54, 2  ;;  %v550_v62 = vrot.slane %v549_v55, 2  ;;  %v509_v63 = vmul.f32 %v474_v59, %v363_v10  ;;  %v517_v0 = vmul.f32 %v498_v60, %v363_v10  ;;  %v476_v3 = vpop.f32.mrb[7].mxu0  ;;  %v500_v4 = vpop.f32.mrb[7].mxu1 }
 0x114   : > { %v529_v5 = vrot.slane %v528_v56, 2  ;;  %v557_v6 = vrot.slane %v556_v57, 2  ;;  %v510_v58 = vmul.f32 %v476_v3, %v364_v16  ;;  %v518_v8 = vmul.f32 %v500_v4, %v364_v16 }
 0x115   : > { %v523_v9 = vadd.f32 %v522_v61, %v521_v54  ;;  %v551_v11 = vadd.f32 %v550_v62, %v549_v55  ;;  %v533_v13 = vadd.f32 %v509_v63, %v507_v46  ;;  %v561_v15 = vadd.f32 %v517_v0, %v515_v48 }
 0x116   : > { %v530_v17 = vadd.f32 %v529_v5, %v528_v56  ;;  %v558_v19 = vadd.f32 %v557_v6, %v556_v57  ;;  %v540_v20 = vadd.f32 %v510_v58, %v508_v52  ;;  %v568_v14 = vadd.f32 %v518_v8, %v516_v53 }
 0x117   : > { %v524_v21 = vrot.slane %v523_v9, 1  ;;  %v552_v22 = vrot.slane %v551_v11, 1  ;;  %v534_v2 = vrot.slane %v533_v13, 4  ;;  %v562_v23 = vrot.slane %v561_v15, 4 }
 0x118   : > { %v531_v24 = vrot.slane %v530_v17, 1  ;;  %v559_v10 = vrot.slane %v558_v19, 1  ;;  %v541_v18 = vrot.slane %v540_v20, 4  ;;  %v569_v25 = vrot.slane %v568_v14, 4 }
 0x119   : > { %v525_v26 = vadd.f32 %v524_v21, %v523_v9  ;;  %v553_v7 = vadd.f32 %v552_v22, %v551_v11  ;;  %v535_v12 = vadd.f32 %v534_v2, %v533_v13  ;;  %v563_v27 = vadd.f32 %v562_v23, %v561_v15 }
 0x11a   : > { %v532_v28 = vadd.f32 %v531_v24, %v530_v17  ;;  %v560_v29 = vadd.f32 %v559_v10, %v558_v19  ;;  %v542_v30 = vadd.f32 %v541_v18, %v540_v20  ;;  %v570_v16 = vadd.f32 %v569_v25, %v568_v14 }
 0x11b   : > { %v536_v31 = vrot.slane %v535_v12, 2  ;;  %v564_v32 = vrot.slane %v563_v27, 2 }
 0x11c   : > { %v583_v33 = vcombine.low %v525_v26, %v532_v28  ;;  %v585_v34 = vcombine.low %v553_v7, %v560_v29  ;;  %v543_v35 = vrot.slane %v542_v30, 2  ;;  %v571_v1 = vrot.slane %v570_v16, 2 }
 0x11d   : > { %v537_v36 = vadd.f32 %v536_v31, %v535_v12  ;;  %v565_v37 = vadd.f32 %v564_v32, %v563_v27 }
 0x11e   : > { %v544_v38 = vadd.f32 %v543_v35, %v542_v30  ;;  %v572_v39 = vadd.f32 %v571_v1, %v570_v16  ;;  %v592_v51 = vrot.slane %v585_v34, 6 }
 0x11f   : > { %v538_v40 = vrot.slane %v537_v36, 1  ;;  %v566_v41 = vrot.slane %v565_v37, 1 }
 0x120   : > { %v545_v42 = vrot.slane %v544_v38, 1  ;;  %v573_v43 = vrot.slane %v572_v39, 1 }
 0x121   : > { %v539_v44 = vadd.f32 %v538_v40, %v537_v36  ;;  %v567_v45 = vadd.f32 %v566_v41, %v565_v37 }
 0x122   : > { %v546_v46 = vadd.f32 %v545_v42, %v544_v38  ;;  %v574_v47 = vadd.f32 %v573_v43, %v572_v39 }
 0x124   : > { %v584_v48 = vcombine.low %v539_v44, %v546_v46  ;;  %v586_v49 = vcombine.low %v567_v45, %v574_v47 }
 0x126   : > { %v587_v50 = vrot.slane %v584_v48, 7  ;;  %v597_v55 = vrot.slane %v586_v49, 5 }
 0x128   : > { %v589_v52 = vsel %vm588_vm1, %v587_v50, %v583_v33 }
 0x129   : > { %v591_v53 = vsel %vm590_vm2, %v587_v50, %v589_v52 }
 0x12a   : > { %v594_v54 = vsel %vm593_vm3, %v592_v51, %v591_v53 }
 0x12b   : > { %v596_v56 = vsel %vm595_vm4, %v592_v51, %v594_v54 }
 0x12c   : > { %v599_v57 = vsel %vm598_vm5, %v597_v55, %v596_v56 }
 0x12d   : > { %v601_v59 = vsel %vm600_vm6, %v597_v55, %v599_v57 }
 0x12e   : > { %603 = vst [vmem:[%s176_s7] sm:$0xff] %v601_v59 }
 0x12f   : > { %831 = shalt.err (!%p828_p5)
}
 0x130   : > { %s832_s26 = scalar_lea.hbm %s1088_s18, 128  ;;  %s836_s29 = scalar_lea.hbm %s1137_s2, 256 }
 0x131   : > { %p833_p6 = scmp.ne.s32.totalorder %s1088_s18, %s832_s26  ;;  %p837_p10 = scmp.lt.u32.totalorder %s1088_s18, %s1137_s2 }
 0x132   : > { %p838_p11 = scmp.lt.u32.totalorder %s836_s29, %s832_s26  ;;  %p840_p13 = scmp.lt.u32.totalorder %s832_s26, %s1088_s18 }
 0x133   : > { %p834_p7 = pnand %p833_p6, %p955_p4 }
 0x134   : > { %p839_p12 = por %p838_p11, %p837_p10 }
 0x135   : > { %p835_p9 = pneg %p834_p7 }
 0x136   : > { %p841_p0 = por %p840_p13, %p839_p12 }
 0x138   : > { %p842_p1 = pnand %p841_p0, %p835_p9 }
 0x13a   : > { %845 = shalt.err (!%p842_p1)
}
 0x13b   : > { %762 = dma.vmem_to_hbm [thread:$0]  (%p955_p4), %s1090_s8, 128, %s1088_s18, %s605_s12  }
 0x13c PF: > { %p768_p2 = scmp.ge.s32.totalorder %s896_s14, 2  ;;  %s633_s4 = sand.u32 1, %s876_s9  }
 0x13d   : > { %s634_s5 = scalar_lea.sflag [#allocation3], %s633_s4 }
 0x13e   : > { %p765_p3 = pnand %p768_p2, %p962_p8 }
 0x140   : > { %871 = dma.done.wait (!%p765_p3), %s634_s5, 128  }
 0x141   : > { %873 = vsyncadd (!%p765_p3), %s634_s5, 4294967168  ;;  %s15_s14 = sadd.s32 1, %s896_s14   ;;  %s1140_s9 = smov %s880_s10 }
 0x142   : > { %p12_p5 = scmp.ge.s32.totalorder %s15_s14, 4   ;;  %s1141_s10 = smov %s884_s11 }
 0x143   : > { %s1142_s11 = smov %s968_s22  ;;  %s1143_s12 = smov %s892_s13 }
 0x144   : > { %s1144_s13 = smov %s1146_s17  ;;  %14 = sbr.rel (!%p12_p5) target bundleno = 4 (0x4), region = 67 }
 0x14b   :  { %639 = vsyncpa [#allocation3], 1 }
 0x14c   :  { %641 = vsyncpa [#allocation3 + $0x1], 1 }

</bundles_post_ra>
